<compile_context>
chip_gen: v6e
topology: v6e:2x2x1
jax: 0.10.0
libtpu: 0.0.40
codegen_flags: <defaults>
</compile_context>

<pallas_src>
import functools

import jax
import jax.numpy as jnp
import numpy as np
from jax import lax
from jax.experimental import pallas as pl
from jax.experimental.pallas import tpu as pltpu


def spp_kernel(bias_ref, x_ref, o_ref, *, W):
    """bias_ref: (8, L)     {0, -inf} additive validity biases, one row / shift.
    x_ref:    (Cb, L)     input channels for this grid step (lane-dense).
    o_ref:    (4, Cb, L)  -> [x | pool5 | pool9 | pool13] along axis 0."""
    Cb, L = x_ref.shape

    x = x_ref[...]
    o_ref[0] = x                               # branch 0 is final: retire x early

    # Flat-offset order must match _shift_biases() in the wrapper.
    offsets = (1, 2, -1, -2, W, 2 * W, -W, -2 * W)
    # Hoist the (1, L) -> (Cb, L) broadcasts once; reused by all three cascade
    # stages (JAX does not CSE broadcast_in_dim, so emit exactly 8 of them).
    biases = [jnp.broadcast_to(bias_ref[k:k + 1, :], (Cb, L)) for k in range(8)]
    w_shifts = list(zip(offsets[:4], biases[:4]))
    h_shifts = list(zip(offsets[4:], biases[4:]))

    def dir_max5(v, shifts):
        # max over {v} U {shift(v, off) + bias_off}; bias is 0 where the shifted
        # read stays inside the row/image, -inf where it wrapped (== -inf pad).
        # NOTE: assumes finite inputs (+inf inputs would give NaN on masked
        # lanes); MaxPool2d inputs are finite in practice.
        acc = v
        for off, b in shifts:
            # out[l] = v[(l + off) % L]; positive modular amount kept because it
            # is verified to lower, and Mosaic lane rotates are amount-agnostic.
            acc = jnp.maximum(acc, pltpu.roll(v, shift=(-off) % L, axis=1) + b)
        return acc

    def pool5(v):            # 5x5, stride 1, -inf "same" padding (separable)
        return dir_max5(dir_max5(v, w_shifts), h_shifts)

    p5 = pool5(x)
    o_ref[1] = p5                              # 5x5,   pad 2
    p9 = pool5(p5)
    o_ref[2] = p9                              # 9x9,   pad 4 (exact SPPF cascade)
    o_ref[3] = pool5(p9)                       # 13x13, pad 6


def _tpu_vmem_capacity_bytes():
    """Per-TensorCore VMEM capacity; conservative 64 MiB (v7x) if unknown."""
    try:
        cap = getattr(pltpu.get_tpu_info(), "vmem_capacity_bytes", None)
        if cap:
            return int(cap)
    except Exception:
        pass
    return 64 << 20


def _pick_channel_block(N, C, L, itemsize, tile_cap_bytes):
    """Channel block Cb such that:
      * Cb divides C,
      * Cb is a multiple of the sublane pack (8 f32 / 16 bf16) OR exactly C,
        so the (Cb, L) block never violates the (8, 128) block-shape rule,
      * the input tile is <= tile_cap_bytes whenever an aligned divisor allows,
      * total parallel grid steps N*(C//Cb) is >=4 (else >=2) when possible
        (pipeline depth + both v7x TensorCores)."""
    pack = 8 * (4 // itemsize) if itemsize in (2, 4) else 8
    max_cb = max(1, tile_cap_bytes // (L * itemsize))
    aligned = [d for d in range(1, C + 1)
               if C % d == 0 and (d % pack == 0 or d == C)]
    cands = [d for d in aligned if d <= max_cb] or aligned
    for min_steps in (4, 2, 1):
        ok = [d for d in cands if N * (C // d) >= min_steps]
        if ok:
            return max(ok)
    return max(cands)


def _shift_biases(H, W, dtype):
    """(8, L) additive validity biases for the eight flat shifts of a 5x5
    "same" max pool.  Rows 0..3: W-direction offsets (+1,+2,-1,-2); rows 4..7:
    H-direction offsets (+W,+2W,-W,-2W).  0 where the shifted read is
    in-bounds, -inf where it wrapped (equivalent to -inf padding)."""
    flat = np.arange(H * W)
    row, col = flat // W, flat % W
    valid = np.stack([col < W - 1, col < W - 2, col >= 1, col >= 2,
                      row < H - 1, row < H - 2, row >= 1, row >= 2])
    return jnp.asarray(np.where(valid, 0.0, -np.inf), dtype=dtype)


def spp(x):
    N, C, H, W = x.shape
    if not jnp.issubdtype(x.dtype, jnp.floating):
        raise TypeError("SPP max-pool padding uses -inf; floating dtype required")
    L = H * W
    itemsize = x.dtype.itemsize

    # Per-generation VMEM budget:
    #   live footprint ~ 10x tile (double-buffered in + 4x out) + 8x tile
    #   (broadcast biases) + ~4x tile (cascade values) ~= 22x tile, kept well
    #   inside 3/4 of physical VMEM.
    vmem_cap = _tpu_vmem_capacity_bytes()          # 128 MiB v5e/v6e, 64 MiB v7x
    tile_cap = vmem_cap // 40                      # ~3.2 MiB / ~1.6 MiB input tile
    vmem_limit = (vmem_cap * 3) // 4               # ~96 MiB / ~48 MiB scoped limit

    Cb = _pick_channel_block(N, C, L, itemsize, tile_cap)
    biases = _shift_biases(H, W, x.dtype)          # (8, L) tiny side input

    xf = x.reshape(N, C, L)      # adjacent-dim merge -> metadata-only reshape

    out = pl.pallas_call(
        functools.partial(spp_kernel, W=W),
        out_shape=jax.ShapeDtypeStruct((N, 4, C, L), x.dtype),
        grid=(N, C // Cb),
        in_specs=[
            pl.BlockSpec((8, L), lambda n, ci: (0, 0)),
            pl.BlockSpec((None, Cb, L), lambda n, ci: (n, ci, 0)),
        ],
        out_specs=pl.BlockSpec((None, 4, Cb, L), lambda n, ci: (n, 0, ci, 0)),
        compiler_params=pltpu.CompilerParams(
            dimension_semantics=("parallel", "parallel"),
            vmem_limit_bytes=int(vmem_limit)),
    )(biases, xf)

    # (N, 4, C, L) -> (N, 4*C, H, W): merges/splits adjacent dims only.
    # Channel order [x | pool5 | pool9 | pool13] matches torch.concat(dim=1).
    return out.reshape(N, 4 * C, H, W)


def spp_reference(x):
    """Pure-JAX reference (exact PyTorch MaxPool2d semantics: -inf padding)."""
    def pool(k, p):
        return lax.reduce_window(
            x, -jnp.inf, lax.max,
            window_dimensions=(1, 1, k, k),
            window_strides=(1, 1, 1, 1),
            padding=((0, 0), (0, 0), (p, p), (p, p)))
    return jnp.concatenate([x, pool(5, 2), pool(9, 4), pool(13, 6)], axis=1)


if __name__ == "__main__":
    # SPP has no learnable parameters (only max-pool layers), so nothing to init.
    key = jax.random.PRNGKey(0)
    x = jax.random.normal(key, (2, 4, 16, 16), dtype=jnp.float32)

    y = spp(x)
    jax.block_until_ready(y)

    y_ref = spp_reference(x)
    assert y.shape == (2, 16, 16, 16), y.shape
    np.testing.assert_allclose(np.asarray(y), np.asarray(y_ref), rtol=0, atol=0)

    print("KERNEL_OK")
</pallas_src>

<mosaic_0001>
module attributes {stable_mosaic.version = 11 : i64} {
  func.func @spp_kernel(%arg0: i32, %arg1: i32, %arg2: memref<8x256xf32, #tpu.memory_space<vmem>>, %arg3: memref<1x4x256xf32, #tpu.memory_space<vmem>>, %arg4: memref<1x4x4x256xf32, #tpu.memory_space<vmem>>) attributes {dimension_semantics = [#tpu.dimension_semantics<parallel>, #tpu.dimension_semantics<parallel>], iteration_bounds = array<i64: 2, 1>, scalar_prefetch = 0 : i64, scratch_operands = 0 : i64, tpu.core_type = #tpu.core_type<tc>, window_params = [{pipeline_mode = #tpu.pipeline_mode<synchronous>, transform_indices = @transform_0, window_bounds = array<i64: 8, 256>}, {transform_indices = @transform_1, window_bounds = array<i64: 1, 4, 256>}, {transform_indices = @transform_2, window_bounds = array<i64: 1, 4, 4, 256>}]} {
    %c0 = arith.constant 0 : index
    %c0_0 = arith.constant 0 : index
    %c0_1 = arith.constant 0 : index
    %0 = vector.load %arg3[%c0, %c0_0, %c0_1] : memref<1x4x256xf32, #tpu.memory_space<vmem>>, vector<1x4x256xf32>
    %1 = vector.shape_cast %0 : vector<1x4x256xf32> to vector<4x256xf32>
    %c0_2 = arith.constant 0 : index
    %c0_3 = arith.constant 0 : index
    %c0_4 = arith.constant 0 : index
    %c0_5 = arith.constant 0 : index
    %2 = vector.load %arg4[%c0_2, %c0_3, %c0_4, %c0_5] : memref<1x4x4x256xf32, #tpu.memory_space<vmem>>, vector<1x1x4x256xf32>
    %3 = vector.shape_cast %2 : vector<1x1x4x256xf32> to vector<4x256xf32>
    %4 = vector.shape_cast %1 : vector<4x256xf32> to vector<1x1x4x256xf32>
    tpu.vector_store %arg4[%c0_2, %c0_3, %c0_4, %c0_5], %4 {strides = array<i32>} : memref<1x4x4x256xf32, #tpu.memory_space<vmem>>, vector<1x1x4x256xf32>,
    %c0_6 = arith.constant 0 : index
    %c0_7 = arith.constant 0 : index
    %5 = vector.load %arg2[%c0_6, %c0_7] : memref<8x256xf32, #tpu.memory_space<vmem>>, vector<1x256xf32>
    %6 = vector.shape_cast %5 : vector<1x256xf32> to vector<1x256xf32>
    %7 = vector.broadcast %6 : vector<1x256xf32> to vector<4x256xf32>
    %c1 = arith.constant 1 : index
    %c0_8 = arith.constant 0 : index
    %8 = vector.load %arg2[%c1, %c0_8] : memref<8x256xf32, #tpu.memory_space<vmem>>, vector<1x256xf32>
    %9 = vector.shape_cast %8 : vector<1x256xf32> to vector<1x256xf32>
    %10 = vector.broadcast %9 : vector<1x256xf32> to vector<4x256xf32>
    %c2 = arith.constant 2 : index
    %c0_9 = arith.constant 0 : index
    %11 = vector.load %arg2[%c2, %c0_9] : memref<8x256xf32, #tpu.memory_space<vmem>>, vector<1x256xf32>
    %12 = vector.shape_cast %11 : vector<1x256xf32> to vector<1x256xf32>
    %13 = vector.broadcast %12 : vector<1x256xf32> to vector<4x256xf32>
    %c3 = arith.constant 3 : index
    %c0_10 = arith.constant 0 : index
    %14 = vector.load %arg2[%c3, %c0_10] : memref<8x256xf32, #tpu.memory_space<vmem>>, vector<1x256xf32>
    %15 = vector.shape_cast %14 : vector<1x256xf32> to vector<1x256xf32>
    %16 = vector.broadcast %15 : vector<1x256xf32> to vector<4x256xf32>
    %c4 = arith.constant 4 : index
    %c0_11 = arith.constant 0 : index
    %17 = vector.load %arg2[%c4, %c0_11] : memref<8x256xf32, #tpu.memory_space<vmem>>, vector<1x256xf32>
    %18 = vector.shape_cast %17 : vector<1x256xf32> to vector<1x256xf32>
    %19 = vector.broadcast %18 : vector<1x256xf32> to vector<4x256xf32>
    %c5 = arith.constant 5 : index
    %c0_12 = arith.constant 0 : index
    %20 = vector.load %arg2[%c5, %c0_12] : memref<8x256xf32, #tpu.memory_space<vmem>>, vector<1x256xf32>
    %21 = vector.shape_cast %20 : vector<1x256xf32> to vector<1x256xf32>
    %22 = vector.broadcast %21 : vector<1x256xf32> to vector<4x256xf32>
    %c6 = arith.constant 6 : index
    %c0_13 = arith.constant 0 : index
    %23 = vector.load %arg2[%c6, %c0_13] : memref<8x256xf32, #tpu.memory_space<vmem>>, vector<1x256xf32>
    %24 = vector.shape_cast %23 : vector<1x256xf32> to vector<1x256xf32>
    %25 = vector.broadcast %24 : vector<1x256xf32> to vector<4x256xf32>
    %c7 = arith.constant 7 : index
    %c0_14 = arith.constant 0 : index
    %26 = vector.load %arg2[%c7, %c0_14] : memref<8x256xf32, #tpu.memory_space<vmem>>, vector<1x256xf32>
    %27 = vector.shape_cast %26 : vector<1x256xf32> to vector<1x256xf32>
    %28 = vector.broadcast %27 : vector<1x256xf32> to vector<4x256xf32>
    %c255_i32 = arith.constant 255 : i32
    %29 = tpu.dynamic_rotate %1 by %c255_i32 dim 1 : vector<4x256xf32>, i32 -> vector<4x256xf32>
    %30 = arith.addf %29, %7 : vector<4x256xf32>
    %31 = arith.maximumf %1, %30 : vector<4x256xf32>
    %c254_i32 = arith.constant 254 : i32
    %32 = tpu.dynamic_rotate %1 by %c254_i32 dim 1 : vector<4x256xf32>, i32 -> vector<4x256xf32>
    %33 = arith.addf %32, %10 : vector<4x256xf32>
    %34 = arith.maximumf %31, %33 : vector<4x256xf32>
    %c1_i32 = arith.constant 1 : i32
    %35 = tpu.dynamic_rotate %1 by %c1_i32 dim 1 : vector<4x256xf32>, i32 -> vector<4x256xf32>
    %36 = arith.addf %35, %13 : vector<4x256xf32>
    %37 = arith.maximumf %34, %36 : vector<4x256xf32>
    %c2_i32 = arith.constant 2 : i32
    %38 = tpu.dynamic_rotate %1 by %c2_i32 dim 1 : vector<4x256xf32>, i32 -> vector<4x256xf32>
    %39 = arith.addf %38, %16 : vector<4x256xf32>
    %40 = arith.maximumf %37, %39 : vector<4x256xf32>
    %c240_i32 = arith.constant 240 : i32
    %41 = tpu.dynamic_rotate %40 by %c240_i32 dim 1 : vector<4x256xf32>, i32 -> vector<4x256xf32>
    %42 = arith.addf %41, %19 : vector<4x256xf32>
    %43 = arith.maximumf %40, %42 : vector<4x256xf32>
    %c224_i32 = arith.constant 224 : i32
    %44 = tpu.dynamic_rotate %40 by %c224_i32 dim 1 : vector<4x256xf32>, i32 -> vector<4x256xf32>
    %45 = arith.addf %44, %22 : vector<4x256xf32>
    %46 = arith.maximumf %43, %45 : vector<4x256xf32>
    %c16_i32 = arith.constant 16 : i32
    %47 = tpu.dynamic_rotate %40 by %c16_i32 dim 1 : vector<4x256xf32>, i32 -> vector<4x256xf32>
    %48 = arith.addf %47, %25 : vector<4x256xf32>
    %49 = arith.maximumf %46, %48 : vector<4x256xf32>
    %c32_i32 = arith.constant 32 : i32
    %50 = tpu.dynamic_rotate %40 by %c32_i32 dim 1 : vector<4x256xf32>, i32 -> vector<4x256xf32>
    %51 = arith.addf %50, %28 : vector<4x256xf32>
    %52 = arith.maximumf %49, %51 : vector<4x256xf32>
    %c0_15 = arith.constant 0 : index
    %c1_16 = arith.constant 1 : index
    %c0_17 = arith.constant 0 : index
    %c0_18 = arith.constant 0 : index
    %53 = vector.load %arg4[%c0_15, %c1_16, %c0_17, %c0_18] : memref<1x4x4x256xf32, #tpu.memory_space<vmem>>, vector<1x1x4x256xf32>
    %54 = vector.shape_cast %53 : vector<1x1x4x256xf32> to vector<4x256xf32>
    %55 = vector.shape_cast %52 : vector<4x256xf32> to vector<1x1x4x256xf32>
    tpu.vector_store %arg4[%c0_15, %c1_16, %c0_17, %c0_18], %55 {strides = array<i32>} : memref<1x4x4x256xf32, #tpu.memory_space<vmem>>, vector<1x1x4x256xf32>,
    %c255_i32_19 = arith.constant 255 : i32
    %56 = tpu.dynamic_rotate %52 by %c255_i32_19 dim 1 : vector<4x256xf32>, i32 -> vector<4x256xf32>
    %57 = arith.addf %56, %7 : vector<4x256xf32>
    %58 = arith.maximumf %52, %57 : vector<4x256xf32>
    %c254_i32_20 = arith.constant 254 : i32
    %59 = tpu.dynamic_rotate %52 by %c254_i32_20 dim 1 : vector<4x256xf32>, i32 -> vector<4x256xf32>
    %60 = arith.addf %59, %10 : vector<4x256xf32>
    %61 = arith.maximumf %58, %60 : vector<4x256xf32>
    %c1_i32_21 = arith.constant 1 : i32
    %62 = tpu.dynamic_rotate %52 by %c1_i32_21 dim 1 : vector<4x256xf32>, i32 -> vector<4x256xf32>
    %63 = arith.addf %62, %13 : vector<4x256xf32>
    %64 = arith.maximumf %61, %63 : vector<4x256xf32>
    %c2_i32_22 = arith.constant 2 : i32
    %65 = tpu.dynamic_rotate %52 by %c2_i32_22 dim 1 : vector<4x256xf32>, i32 -> vector<4x256xf32>
    %66 = arith.addf %65, %16 : vector<4x256xf32>
    %67 = arith.maximumf %64, %66 : vector<4x256xf32>
    %c240_i32_23 = arith.constant 240 : i32
    %68 = tpu.dynamic_rotate %67 by %c240_i32_23 dim 1 : vector<4x256xf32>, i32 -> vector<4x256xf32>
    %69 = arith.addf %68, %19 : vector<4x256xf32>
    %70 = arith.maximumf %67, %69 : vector<4x256xf32>
    %c224_i32_24 = arith.constant 224 : i32
    %71 = tpu.dynamic_rotate %67 by %c224_i32_24 dim 1 : vector<4x256xf32>, i32 -> vector<4x256xf32>
    %72 = arith.addf %71, %22 : vector<4x256xf32>
    %73 = arith.maximumf %70, %72 : vector<4x256xf32>
    %c16_i32_25 = arith.constant 16 : i32
    %74 = tpu.dynamic_rotate %67 by %c16_i32_25 dim 1 : vector<4x256xf32>, i32 -> vector<4x256xf32>
    %75 = arith.addf %74, %25 : vector<4x256xf32>
    %76 = arith.maximumf %73, %75 : vector<4x256xf32>
    %c32_i32_26 = arith.constant 32 : i32
    %77 = tpu.dynamic_rotate %67 by %c32_i32_26 dim 1 : vector<4x256xf32>, i32 -> vector<4x256xf32>
    %78 = arith.addf %77, %28 : vector<4x256xf32>
    %79 = arith.maximumf %76, %78 : vector<4x256xf32>
    %c0_27 = arith.constant 0 : index
    %c2_28 = arith.constant 2 : index
    %c0_29 = arith.constant 0 : index
    %c0_30 = arith.constant 0 : index
    %80 = vector.load %arg4[%c0_27, %c2_28, %c0_29, %c0_30] : memref<1x4x4x256xf32, #tpu.memory_space<vmem>>, vector<1x1x4x256xf32>
    %81 = vector.shape_cast %80 : vector<1x1x4x256xf32> to vector<4x256xf32>
    %82 = vector.shape_cast %79 : vector<4x256xf32> to vector<1x1x4x256xf32>
    tpu.vector_store %arg4[%c0_27, %c2_28, %c0_29, %c0_30], %82 {strides = array<i32>} : memref<1x4x4x256xf32, #tpu.memory_space<vmem>>, vector<1x1x4x256xf32>,
    %c255_i32_31 = arith.constant 255 : i32
    %83 = tpu.dynamic_rotate %79 by %c255_i32_31 dim 1 : vector<4x256xf32>, i32 -> vector<4x256xf32>
    %84 = arith.addf %83, %7 : vector<4x256xf32>
    %85 = arith.maximumf %79, %84 : vector<4x256xf32>
    %c254_i32_32 = arith.constant 254 : i32
    %86 = tpu.dynamic_rotate %79 by %c254_i32_32 dim 1 : vector<4x256xf32>, i32 -> vector<4x256xf32>
    %87 = arith.addf %86, %10 : vector<4x256xf32>
    %88 = arith.maximumf %85, %87 : vector<4x256xf32>
    %c1_i32_33 = arith.constant 1 : i32
    %89 = tpu.dynamic_rotate %79 by %c1_i32_33 dim 1 : vector<4x256xf32>, i32 -> vector<4x256xf32>
    %90 = arith.addf %89, %13 : vector<4x256xf32>
    %91 = arith.maximumf %88, %90 : vector<4x256xf32>
    %c2_i32_34 = arith.constant 2 : i32
    %92 = tpu.dynamic_rotate %79 by %c2_i32_34 dim 1 : vector<4x256xf32>, i32 -> vector<4x256xf32>
    %93 = arith.addf %92, %16 : vector<4x256xf32>
    %94 = arith.maximumf %91, %93 : vector<4x256xf32>
    %c240_i32_35 = arith.constant 240 : i32
    %95 = tpu.dynamic_rotate %94 by %c240_i32_35 dim 1 : vector<4x256xf32>, i32 -> vector<4x256xf32>
    %96 = arith.addf %95, %19 : vector<4x256xf32>
    %97 = arith.maximumf %94, %96 : vector<4x256xf32>
    %c224_i32_36 = arith.constant 224 : i32
    %98 = tpu.dynamic_rotate %94 by %c224_i32_36 dim 1 : vector<4x256xf32>, i32 -> vector<4x256xf32>
    %99 = arith.addf %98, %22 : vector<4x256xf32>
    %100 = arith.maximumf %97, %99 : vector<4x256xf32>
    %c16_i32_37 = arith.constant 16 : i32
    %101 = tpu.dynamic_rotate %94 by %c16_i32_37 dim 1 : vector<4x256xf32>, i32 -> vector<4x256xf32>
    %102 = arith.addf %101, %25 : vector<4x256xf32>
    %103 = arith.maximumf %100, %102 : vector<4x256xf32>
    %c32_i32_38 = arith.constant 32 : i32
    %104 = tpu.dynamic_rotate %94 by %c32_i32_38 dim 1 : vector<4x256xf32>, i32 -> vector<4x256xf32>
    %105 = arith.addf %104, %28 : vector<4x256xf32>
    %106 = arith.maximumf %103, %105 : vector<4x256xf32>
    %c0_39 = arith.constant 0 : index
    %c3_40 = arith.constant 3 : index
    %c0_41 = arith.constant 0 : index
    %c0_42 = arith.constant 0 : index
    %107 = vector.load %arg4[%c0_39, %c3_40, %c0_41, %c0_42] : memref<1x4x4x256xf32, #tpu.memory_space<vmem>>, vector<1x1x4x256xf32>
    %108 = vector.shape_cast %107 : vector<1x1x4x256xf32> to vector<4x256xf32>
    %109 = vector.shape_cast %106 : vector<4x256xf32> to vector<1x1x4x256xf32>
    tpu.vector_store %arg4[%c0_39, %c3_40, %c0_41, %c0_42], %109 {strides = array<i32>} : memref<1x4x4x256xf32, #tpu.memory_space<vmem>>, vector<1x1x4x256xf32>,
    return
  }
  func.func @transform_0(%arg0: i32, %arg1: i32) -> (i32, i32) {
    %c0_i32 = arith.constant 0 : i32
    %c0_i32_0 = arith.constant 0 : i32
    %c0_i32_1 = arith.constant 0 : i32
    return %c0_i32, %c0_i32_0 : i32, i32
  }
  func.func @transform_1(%arg0: i32, %arg1: i32) -> (i32, i32, i32) {
    %c0_i32 = arith.constant 0 : i32
    %c0_i32_0 = arith.constant 0 : i32
    return %arg0, %arg1, %c0_i32 : i32, i32, i32
  }
  func.func @transform_2(%arg0: i32, %arg1: i32) -> (i32, i32, i32, i32) {
    %c0_i32 = arith.constant 0 : i32
    %c0_i32_0 = arith.constant 0 : i32
    %c0_i32_1 = arith.constant 0 : i32
    return %arg0, %c0_i32, %arg1, %c0_i32_0 : i32, i32, i32, i32
  }
}

</mosaic_0001>

<bundles_post_ra>
// kernel: tpu_custom_call.1
= control target key start
LH: loop header
LB: loop body
LE: loop exit
PB: predicated region body
PF: predicated region fallthrough
CT: control target
= control target key end

     0   :  { %7 = vsyncpa [#allocation3], 0  ;;  %s1478_s0 = inlined_call_operand.hbm [shape: f32[8,256], index: 0, kind: input, shape index: {}]   ;;  %s1479_s1 = inlined_call_operand.hbm [shape: f32[2,4,256], index: 1, kind: input, shape index: {}]   ;;  %s1480_s2 = inlined_call_operand.hbm [shape: f32[2,4,4,256], index: 2, kind: output, shape index: {}]  }
   0x1   :  { %8 = vsyncpa [#allocation6], 0 }
   0x2   :  { %10 = vsyncpa [#allocation6 + $0x1], 0 }
   0x3   :  { %11 = vsyncpa [#allocation4], 0 }
   0x4   :  { %13 = vsyncpa [#allocation4 + $0x1], 0  ;;  %s1031_s9 = smov 0   ;;  %s1033_s10 = smov 0  }
   0x5   :  { %s1035_s11 = smov 0   ;;  %s1037_s12 = smov 0  }
   0x6   :  { %s1039_s13 = smov 0   ;;  %s1041_s14 = smov 0  }
   0x7 LB: > { %s757_s15 = sadd.s32 4294967295, %s1001_s14   ;;  %s758_s16 = sadd.s32 4294967294, %s1001_s14   ;;  %s1001_s14 = sphi %s1041_s14, %s19_s14   ;;  %s997_s13 = sphi %s1039_s13, %s1497_s13   ;;  %s993_s12 = sphi %s1037_s12, %s1496_s12   ;;  %s989_s11 = sphi %s1035_s11, %s1495_s11   ;;  %s985_s10 = sphi %s1033_s10, %s1494_s10   ;;  %s981_s9 = sphi %s1031_s9, %s1493_s9  }
   0x8   : > { %p74_p0 = scmp.ne.s32.totalorder %s985_s10, %s981_s9  ;;  %p1065_p1 = scmp.eq.s32.totalorder %s757_s15, 0 }
   0x9   : > { %p1069_p2 = scmp.eq.s32.totalorder %s757_s15, 1  ;;  %p106_p3 = scmp.eq.s32.totalorder %s758_s16, 1 }
   0xa   : > { %p1075_p4 = por %p1065_p1, %p74_p0  ;;  %p759_p5 = scmp.ge.s32.totalorder %s1001_s14, 1 }
   0xb   : > { %p1080_p6 = por %p106_p3, %p74_p0  ;;  %p113_p7 = scmp.lt.s32.totalorder %s1001_s14, 3 }
   0xc   : > { %s1484_s19 = scalar_select %p1075_p4, 1, 0 }
   0xd   : > { %s1485_s20 = scalar_select %p1080_p6, 1, 0 }
   0xe   : > { %p1085_p8 = pnand %p759_p5, %p113_p7  ;;  %s1003_s22 = smov [#allocation2]  }
   0xf   : > { %s126_s23 = sshll.u32 %s1003_s22, 4  ;;  %s31_s25 = sadd.s32 1, %s997_s13  ;;  %s127_s23 = int_to_ptr.vmem [resolvable:$true] %s126_s23 }
  0x10   : > { %p787_p10 = pneg %p1085_p8  ;;  %s61_s26 = sadd.s32 1, %s989_s11 }
  0x11   : > { %p33_p12 = scmp.ge.s32.totalorder %s31_s25, 2  ;;  %s874_s27 = scalar_lea.vmem %s127_s23, 256 }
  0x12   : > { %p1094_p11 = pnand %p787_p10, %p1065_p1  ;;  %p875_p0 = scmp.ne.s32.totalorder %s127_s23, %s874_s27 }
  0x13   : > { %p882_p7 = scmp.lt.s32.totalorder %s127_s23, %s127_s23  ;;  %p883_p6 = scmp.lt.s32.totalorder %s874_s27, %s874_s27 }
  0x14   : > { %p865_p13 = pneg %p1094_p11 }
  0x15   : > { %p884_p9 = por %p883_p6, %p882_p7 }
  0x16   : > { %p877_p3 = pnand %p875_p0, %p865_p13 }
  0x18   : > { %p878_p5 = pneg %p877_p3 }
  0x1a   : > { %p885_p4 = pnand %p884_p9, %p878_p5 }
  0x1c   : > { %888 = shalt.err (!%p885_p4)
}
  0x1d   : > { %790 = dma.hbm_to_vmem [thread:$0]  (!%p1094_p11), %s1478_s0, 256, %s127_s23, [#allocation3]  }
  0x1e   : > { %s1499_s25 = smov (%p33_p12, %s31_s25), 0  ;;  %p68_p6 = scmp.ne.s32.totalorder %s989_s11, %s985_s10 }
  0x1f   : > { %p69_p4 = scmp.eq.s32.totalorder %s1001_s14, 0  ;;  %s56_s30 = ssub.s32 %s997_s13, %s1499_s25 }
  0x20   : > { %p800_p9 = scmp.lt.s32.totalorder %s1001_s14, 2  ;;  %p59_p10 = scmp.eq.s32.totalorder %s56_s30, 0 }
  0x21   : > { %p70_p13 = por %p69_p4, %p68_p6  ;;  %p1117_p0 = por %p1069_p2, %p68_p6 }
  0x22   : > { %s137_s4 = sand.u32 1, %s989_s11   ;;  %s777_s7 = sshll.u32 %s997_s13, 7 }
  0x23   : > { %s1123_s5 = scalar_select %p59_p10, %s989_s11, %s61_s26  }
  0x24   : > { %s762_s6 = sshll.u32 %s137_s4, 3  ;;  %s149_s16 = scalar_lea.hbm %s1479_s1, %s777_s7 }
  0x25   : > { %s141_s22 = scalar_lea.vmem [#allocation5], %s762_s6  ;;  %p1129_p11 = pnand %p800_p9, %p70_p13 }
  0x26   : > { %s151_s23 = sshll.u32 %s141_s22, 4  ;;  %s138_s18 = scalar_lea.sflag [#allocation6], %s137_s4  ;;  %s152_s23 = int_to_ptr.vmem [resolvable:$true] %s151_s23 }
  0x27   : > { %p891_p2 = pneg %p1129_p11  ;;  %s902_s27 = scalar_lea.vmem %s152_s23, 128 }
  0x28   : > { %p903_p12 = scmp.ne.s32.totalorder %s152_s23, %s902_s27  ;;  %s1004_s26 = smov [#allocation5]  }
  0x29   : > { %s907_s28 = sshll.u32 %s1004_s26, 4  ;;  %s908_s28 = int_to_ptr.vmem [resolvable:$false] %s907_s28 }
  0x2a   : > { %p905_p3 = pnand %p903_p12, %p891_p2  ;;  %s909_s29 = scalar_lea.vmem %s908_s28, 256 }
  0x2b   : > { %p910_p7 = scmp.lt.s32.totalorder %s152_s23, %s908_s28  ;;  %p911_p6 = scmp.lt.s32.totalorder %s909_s29, %s902_s27 }
  0x2c   : > { %p906_p5 = pneg %p905_p3 }
  0x2d   : > { %p912_p4 = por %p911_p6, %p910_p7 }
  0x2f   : > { %p913_p10 = pnand %p912_p4, %p906_p5 }
  0x31   : > { %916 = shalt.err (!%p913_p10)
}
  0x32   : > { %794 = dma.hbm_to_vmem [thread:$0]  (!%p1129_p11), %s149_s16, 128, %s152_s23, %s138_s18  }
  0x33   : > { %160 = sbr.rel (%p1085_p8) target bundleno = 890 (0x37a), region = 28 }
  0x38   : > { %968 = dma.done.wait (%p1065_p1), [#allocation3], 256  }
  0x39   : > { %970 = vsyncadd (%p1065_p1), [#allocation3], 4294967040  ;;  %s1144_s30 = sand.u32 1, %s985_s10   ;;  %p1490_p9 = scmp.ne.s32.totalorder %s1484_s19, 0 }
  0x3a   : > { %s767_s4 = sshll.u32 %s1144_s30, 3  ;;  %s167_s6 = scalar_lea.sflag [#allocation6], %s1144_s30 }
  0x3b   : > { %s170_s7 = scalar_lea.vmem [#allocation5], %s767_s4 }
  0x3c   : > { %972 = dma.done.wait (%p1490_p9), %s167_s6, 128  }
  0x3d   : > { %974 = vsyncadd (%p1490_p9), %s167_s6, 4294967168  ;;  %v1152_v0 = vld [vmem:[%s170_s7] sm:$0xff]  ;;  %s1005_s21 = smov 126   ;;  %s1006_s17 = smov 127   ;;  %v195_v2 = vlaneseq }
  0x3e   : > { %315 = vrot.lane.b32.xlu1 %v1152_v0, %s1005_s21  ;;  %299 = vrot.lane.b32.xlu0 %v1152_v0, %s1006_s17  ;;  %v297_v1 = vcombine.high %v1152_v0, %v1152_v0  ;;  %s1007_s8 = smov 1   ;;  %s1008_s19 = smov 2   ;;  %v206_v7 = vld [vmem:[#allocation2 + $0x1] ss:$8 sm:$0x3] }
  0x3f   : > { %v196_v3 = vshrl.u32 %v195_v2, 7  ;;  %v1168_v4 = vand.u32 127, %v195_v2  ;;  %v193_v8 = vld [vmem:[#allocation2] ss:$8 sm:$0x3]  ;;  %s1009_s15 = smov 112  }
  0x40   : > { %v219_v11 = vld [vmem:[#allocation2 + $0x2] ss:$8 sm:$0x3]  ;;  %v232_v28 = vld [vmem:[#allocation2 + $0x3] ss:$8 sm:$0x3] }
  0x41   : > { %v1170_v5 = vsub.s32 0, %v196_v3  ;;  %v1172_v6 = vsub.s32 1, %v196_v3  ;;  %vm319_vm0 = vcmp.lt.s32.totalorder %v1168_v4, 126  ;;  %vm305_vm1 = vcmp.lt.s32.totalorder %v1168_v4, 127  ;;  %s1010_s16 = smov 96   ;;  %s768_s22 = sshll.u32 %s1144_s30, 5 }
  0x42   : > { %317 = vrot.lane.b32.xlu1 %v297_v1, %s1005_s21  ;;  %301 = vrot.lane.b32.xlu0 %v297_v1, %s1006_s17  ;;  %vm333_vm2 = vcmp.lt.s32.totalorder %v1168_v4, 1  ;;  %vm347_vm3 = vcmp.lt.s32.totalorder %v1168_v4, 2  ;;  %s1011_s23 = smov 16   ;;  %s1233_s24 = scalar_lea.vmem [#allocation7], %s768_s22  ;;  %vm364_vm4 = vcmp.lt.s32.totalorder %v1168_v4, 112  ;;  %vm378_vm5 = vcmp.lt.s32.totalorder %v1168_v4, 96 }
  0x43   : > { %v1177_v12 = vrot.slane %v206_v7, %v1170_v5  ;;  %v1180_v13 = vrot.slane %v206_v7, %v1172_v6  ;;  %v1183_v14 = vrot.slane %v193_v8, %v1170_v5  ;;  %v1186_v15 = vrot.slane %v193_v8, %v1172_v6  ;;  %192 = vst [vmem:[%s1233_s24] sm:$0xff] %v1152_v0  ;;  %s1012_s18 = smov 32   ;;  %v245_v52 = vld [vmem:[#allocation2 + $0x4] ss:$8 sm:$0x3]  ;;  %s658_s27 = sshll.u32 %s1233_s24, 4  ;;  %s1424_s27 = int_to_ptr.vmem [resolvable:$true] %s658_s27 }
  0x44   : > { %v1189_v18 = vrot.slane %v219_v11, %v1170_v5  ;;  %v1192_v19 = vrot.slane %v219_v11, %v1172_v6  ;;  %v1213_v34 = vrot.slane %v232_v28, %v1170_v5  ;;  %v1216_v35 = vrot.slane %v232_v28, %v1172_v6  ;;  %v258_v54 = vld [vmem:[#allocation2 + $0x5] ss:$8 sm:$0x3]  ;;  %v271_v63 = vld [vmem:[#allocation2 + $0x6] ss:$8 sm:$0x3] }
  0x45   : > { %v1242_v55 = vrot.slane %v245_v52, %v1170_v5  ;;  %v1245_v56 = vrot.slane %v245_v52, %v1172_v6  ;;  %v1252_v61 = vrot.slane %v258_v54, %v1170_v5  ;;  %v1255_v62 = vrot.slane %v258_v54, %v1172_v6  ;;  %s778_s26 = sshll.u32 %s993_s12, 9  ;;  %s643_s6 = scalar_lea.sflag [#allocation4], %s1144_s30 }
  0x46   : > { %331 = vrot.lane.b32.xlu1 %v297_v1, %s1007_s8  ;;  %329 = vrot.lane.b32.xlu0 %v1152_v0, %s1007_s8  ;;  %v1265_v8 = vrot.slane %v271_v63, %v1170_v5  ;;  %vm392_vm6 = vcmp.lt.s32.totalorder %v1168_v4, 16  ;;  %vm406_vm7 = vcmp.lt.s32.totalorder %v1168_v4, 32  ;;  %s1429_s4 = scalar_lea.hbm %s1480_s2, %s778_s26  ;;  %s917_s7 = scalar_lea.vmem %s1424_s27, 512 }
  0x47   : > { %p918_p1 = scmp.ne.s32.totalorder %s1424_s27, %s917_s7  ;;  %s1013_s12 = smov [#allocation7]  }
  0x49   : > { %p919_p8 = pnand %p918_p1, %p1117_p0 }
  0x4a   : > { %345 = vrot.lane.b32.xlu1 %v297_v1, %s1008_s19  ;;  %343 = vrot.lane.b32.xlu0 %v1152_v0, %s1008_s19 }
  0x4b   : > { %p920_p13 = pneg %p919_p8 }
  0xb0   : > { %v316_v9 = vpop.permute.xlu1 %315  ;;  %v300_v10 = vpop.permute.xlu0 %299 }
  0xb4   : > { %v318_v16 = vpop.permute.xlu1 %317  ;;  %v302_v17 = vpop.permute.xlu0 %301 }
  0xb5   : > { %v320_v20 = vsel %vm319_vm0, %v316_v9, %v318_v16  ;;  %v321_v21 = vsel %vm319_vm0, %v318_v16, %v316_v9  ;;  %v306_v22 = vsel %vm305_vm1, %v300_v10, %v302_v17  ;;  %v307_v23 = vsel %vm305_vm1, %v302_v17, %v300_v10  ;;  %v284_v17 = vld [vmem:[#allocation2 + $0x7] ss:$8 sm:$0x3] }
  0xb6   : > { %v322_v24 = vadd.f32 %v320_v20, %v1177_v12  ;;  %v323_v25 = vadd.f32 %v321_v21, %v1180_v13  ;;  %v308_v26 = vadd.f32 %v306_v22, %v1183_v14  ;;  %v309_v27 = vadd.f32 %v307_v23, %v1186_v15 }
  0xb7   : > { %v1270_v16 = vrot.slane %v271_v63, %v1172_v6 }
  0xb8   : > { %v312_v29 = vcombine.low %v308_v26, %v309_v27  ;;  %v332_v30 = vpop.permute.xlu1 %331  ;;  %v330_v31 = vpop.permute.xlu0 %329  ;;  %v326_v36 = vcombine.low %v322_v24, %v323_v25  ;;  %v1278_v24 = vrot.slane %v284_v17, %v1170_v5  ;;  %v1281_v25 = vrot.slane %v284_v17, %v1172_v6 }
  0xb9   : > { %v334_v32 = vsel %vm333_vm2, %v330_v31, %v332_v30  ;;  %v335_v33 = vsel %vm333_vm2, %v332_v30, %v330_v31 }
  0xba   : > { %v314_v37 = vmax.f32 %v1152_v0, %v312_v29  ;;  %v336_v38 = vadd.f32 %v335_v33, %v1189_v18  ;;  %v337_v39 = vadd.f32 %v334_v32, %v1192_v19 }
  0xbc   : > { %v328_v40 = vmax.f32 %v314_v37, %v326_v36  ;;  %v340_v41 = vcombine.low %v336_v38, %v337_v39  ;;  %v346_v42 = vpop.permute.xlu1 %345  ;;  %v344_v43 = vpop.permute.xlu0 %343 }
  0xbd   : > { %v348_v44 = vsel %vm347_vm3, %v344_v43, %v346_v42  ;;  %v349_v45 = vsel %vm347_vm3, %v346_v42, %v344_v43 }
  0xbe   : > { %v350_v46 = vadd.f32 %v349_v45, %v1213_v34  ;;  %v351_v47 = vadd.f32 %v348_v44, %v1216_v35  ;;  %v342_v48 = vmax.f32 %v328_v40, %v340_v41 }
  0xc0   : > { %v354_v49 = vcombine.low %v350_v46, %v351_v47 }
  0xc2   : > { %v356_v50 = vmax.f32 %v342_v48, %v354_v49 }
  0xc4   : > { %360 = vrot.lane.b32.xlu0 %v356_v50, %s1009_s15  ;;  %v358_v51 = vcombine.high %v356_v50, %v356_v50 }
  0xc6   : > { %362 = vrot.lane.b32.xlu1 %v358_v51, %s1009_s15 }
  0xc8   : > { %374 = vrot.lane.b32.xlu0 %v356_v50, %s1010_s16 }
  0xca   : > { %376 = vrot.lane.b32.xlu1 %v358_v51, %s1010_s16 }
  0xcc   : > { %388 = vrot.lane.b32.xlu0 %v356_v50, %s1011_s23 }
  0xce   : > { %390 = vrot.lane.b32.xlu1 %v358_v51, %s1011_s23 }
  0xd0   : > { %402 = vrot.lane.b32.xlu0 %v356_v50, %s1012_s18 }
  0xd2   : > { %404 = vrot.lane.b32.xlu1 %v358_v51, %s1012_s18 }
 0x136   : > { %v361_v53 = vpop.permute.xlu0 %360 }
 0x138   : > { %v363_v57 = vpop.permute.xlu1 %362 }
 0x139   : > { %v365_v58 = vsel %vm364_vm4, %v361_v53, %v363_v57  ;;  %v366_v59 = vsel %vm364_vm4, %v363_v57, %v361_v53 }
 0x13a   : > { %v375_v60 = vpop.permute.xlu0 %374  ;;  %v367_v0 = vadd.f32 %v365_v58, %v1242_v55  ;;  %v368_v1 = vadd.f32 %v366_v59, %v1245_v56 }
 0x13c   : > { %v377_v2 = vpop.permute.xlu1 %376  ;;  %v371_v20 = vcombine.low %v367_v0, %v368_v1 }
 0x13d   : > { %v379_v3 = vsel %vm378_vm5, %v375_v60, %v377_v2  ;;  %v380_v7 = vsel %vm378_vm5, %v377_v2, %v375_v60 }
 0x13e   : > { %v381_v9 = vadd.f32 %v379_v3, %v1252_v61  ;;  %v382_v10 = vadd.f32 %v380_v7, %v1255_v62  ;;  %v389_v11 = vpop.permute.xlu0 %388  ;;  %v373_v29 = vmax.f32 %v356_v50, %v371_v20 }
 0x140   : > { %v391_v21 = vpop.permute.xlu1 %390  ;;  %v385_v26 = vcombine.low %v381_v9, %v382_v10 }
 0x141   : > { %v393_v22 = vsel %vm392_vm6, %v389_v11, %v391_v21  ;;  %v394_v23 = vsel %vm392_vm6, %v391_v21, %v389_v11 }
 0x142   : > { %v395_v27 = vadd.f32 %v394_v23, %v1265_v8  ;;  %v396_v28 = vadd.f32 %v393_v22, %v1270_v16  ;;  %v403_v31 = vpop.permute.xlu0 %402  ;;  %v387_v6 = vmax.f32 %v373_v29, %v385_v26 }
 0x144   : > { %v399_v30 = vcombine.low %v395_v27, %v396_v28  ;;  %v405_v32 = vpop.permute.xlu1 %404 }
 0x145   : > { %v407_v33 = vsel %vm406_vm7, %v403_v31, %v405_v32  ;;  %v408_v5 = vsel %vm406_vm7, %v405_v32, %v403_v31 }
 0x146   : > { %v409_v36 = vadd.f32 %v408_v5, %v1278_v24  ;;  %v410_v37 = vadd.f32 %v407_v33, %v1281_v25  ;;  %v401_v38 = vmax.f32 %v387_v6, %v399_v30 }
 0x148   : > { %v413_v39 = vcombine.low %v409_v36, %v410_v37 }
 0x14a   : > { %v415_v40 = vmax.f32 %v401_v38, %v413_v39 }
 0x14c   : > { %421 = vrot.lane.b32.xlu0 %v415_v40, %s1006_s17  ;;  %v419_v41 = vcombine.high %v415_v40, %v415_v40  ;;  %769 = vst [vmem:[%s1233_s24 + $0x8] sm:$0xff] %v415_v40 }
 0x14e   : > { %423 = vrot.lane.b32.xlu1 %v419_v41, %s1006_s17 }
 0x150   : > { %434 = vrot.lane.b32.xlu0 %v415_v40, %s1005_s21 }
 0x152   : > { %436 = vrot.lane.b32.xlu1 %v419_v41, %s1005_s21 }
 0x154   : > { %447 = vrot.lane.b32.xlu0 %v415_v40, %s1007_s8 }
 0x156   : > { %449 = vrot.lane.b32.xlu1 %v419_v41, %s1007_s8 }
 0x158   : > { %460 = vrot.lane.b32.xlu0 %v415_v40, %s1008_s19 }
 0x15a   : > { %462 = vrot.lane.b32.xlu1 %v419_v41, %s1008_s19 }
 0x1be   : > { %v422_v42 = vpop.permute.xlu0 %421 }
 0x1c0   : > { %v424_v43 = vpop.permute.xlu1 %423 }
 0x1c1   : > { %v425_v44 = vsel %vm305_vm1, %v422_v42, %v424_v43  ;;  %v426_v45 = vsel %vm305_vm1, %v424_v43, %v422_v42 }
 0x1c2   : > { %v435_v46 = vpop.permute.xlu0 %434  ;;  %v427_v47 = vadd.f32 %v425_v44, %v1183_v14  ;;  %v428_v48 = vadd.f32 %v426_v45, %v1186_v15 }
 0x1c4   : > { %v437_v49 = vpop.permute.xlu1 %436  ;;  %v431_v57 = vcombine.low %v427_v47, %v428_v48 }
 0x1c5   : > { %v438_v50 = vsel %vm319_vm0, %v435_v46, %v437_v49  ;;  %v439_v51 = vsel %vm319_vm0, %v437_v49, %v435_v46 }
 0x1c6   : > { %v440_v52 = vadd.f32 %v438_v50, %v1177_v12  ;;  %v441_v53 = vadd.f32 %v439_v51, %v1180_v13  ;;  %v448_v54 = vpop.permute.xlu0 %447  ;;  %v433_v2 = vmax.f32 %v415_v40, %v431_v57 }
 0x1c8   : > { %v450_v58 = vpop.permute.xlu1 %449  ;;  %v444_v63 = vcombine.low %v440_v52, %v441_v53 }
 0x1c9   : > { %v451_v59 = vsel %vm333_vm2, %v448_v54, %v450_v58  ;;  %v452_v60 = vsel %vm333_vm2, %v450_v58, %v448_v54 }
 0x1ca   : > { %v453_v0 = vadd.f32 %v452_v60, %v1189_v18  ;;  %v454_v1 = vadd.f32 %v451_v59, %v1192_v19  ;;  %v461_v7 = vpop.permute.xlu0 %460  ;;  %v446_v17 = vmax.f32 %v433_v2, %v444_v63 }
 0x1cc   : > { %v457_v3 = vcombine.low %v453_v0, %v454_v1  ;;  %v463_v9 = vpop.permute.xlu1 %462 }
 0x1cd   : > { %v464_v10 = vsel %vm347_vm3, %v461_v7, %v463_v9  ;;  %v465_v11 = vsel %vm347_vm3, %v463_v9, %v461_v7 }
 0x1ce   : > { %v466_v20 = vadd.f32 %v465_v11, %v1213_v34  ;;  %v467_v21 = vadd.f32 %v464_v10, %v1216_v35  ;;  %v459_v22 = vmax.f32 %v446_v17, %v457_v3 }
 0x1d0   : > { %v470_v23 = vcombine.low %v466_v20, %v467_v21 }
 0x1d2   : > { %v472_v26 = vmax.f32 %v459_v22, %v470_v23 }
 0x1d4   : > { %476 = vrot.lane.b32.xlu0 %v472_v26, %s1009_s15  ;;  %v474_v27 = vcombine.high %v472_v26, %v472_v26 }
 0x1d6   : > { %478 = vrot.lane.b32.xlu1 %v474_v27, %s1009_s15 }
 0x1d8   : > { %489 = vrot.lane.b32.xlu0 %v472_v26, %s1010_s16 }
 0x1da   : > { %491 = vrot.lane.b32.xlu1 %v474_v27, %s1010_s16 }
 0x1dc   : > { %502 = vrot.lane.b32.xlu0 %v472_v26, %s1011_s23 }
 0x1de   : > { %504 = vrot.lane.b32.xlu1 %v474_v27, %s1011_s23 }
 0x1e0   : > { %515 = vrot.lane.b32.xlu0 %v472_v26, %s1012_s18 }
 0x1e2   : > { %517 = vrot.lane.b32.xlu1 %v474_v27, %s1012_s18 }
 0x246   : > { %v477_v28 = vpop.permute.xlu0 %476 }
 0x248   : > { %v479_v29 = vpop.permute.xlu1 %478 }
 0x249   : > { %v480_v30 = vsel %vm364_vm4, %v477_v28, %v479_v29  ;;  %v481_v31 = vsel %vm364_vm4, %v479_v29, %v477_v28 }
 0x24a   : > { %v490_v32 = vpop.permute.xlu0 %489  ;;  %v482_v33 = vadd.f32 %v480_v30, %v1242_v55  ;;  %v483_v5 = vadd.f32 %v481_v31, %v1245_v56 }
 0x24c   : > { %v492_v6 = vpop.permute.xlu1 %491  ;;  %v486_v41 = vcombine.low %v482_v33, %v483_v5 }
 0x24d   : > { %v493_v36 = vsel %vm378_vm5, %v490_v32, %v492_v6  ;;  %v494_v37 = vsel %vm378_vm5, %v492_v6, %v490_v32 }
 0x24e   : > { %v495_v38 = vadd.f32 %v493_v36, %v1252_v61  ;;  %v496_v39 = vadd.f32 %v494_v37, %v1255_v62  ;;  %v503_v40 = vpop.permute.xlu0 %502  ;;  %v488_v48 = vmax.f32 %v472_v26, %v486_v41 }
 0x250   : > { %v505_v42 = vpop.permute.xlu1 %504  ;;  %v499_v45 = vcombine.low %v495_v38, %v496_v39 }
 0x251   : > { %v506_v43 = vsel %vm392_vm6, %v503_v40, %v505_v42  ;;  %v507_v44 = vsel %vm392_vm6, %v505_v42, %v503_v40 }
 0x252   : > { %v508_v46 = vadd.f32 %v507_v44, %v1265_v8  ;;  %v509_v47 = vadd.f32 %v506_v43, %v1270_v16  ;;  %v516_v50 = vpop.permute.xlu0 %515  ;;  %v501_v54 = vmax.f32 %v488_v48, %v499_v45 }
 0x254   : > { %v512_v49 = vcombine.low %v508_v46, %v509_v47  ;;  %v518_v51 = vpop.permute.xlu1 %517 }
 0x255   : > { %v519_v52 = vsel %vm406_vm7, %v516_v50, %v518_v51  ;;  %v520_v53 = vsel %vm406_vm7, %v518_v51, %v516_v50 }
 0x256   : > { %v521_v57 = vadd.f32 %v520_v53, %v1278_v24  ;;  %v522_v58 = vadd.f32 %v519_v52, %v1281_v25  ;;  %v514_v59 = vmax.f32 %v501_v54, %v512_v49 }
 0x258   : > { %v525_v60 = vcombine.low %v521_v57, %v522_v58 }
 0x25a   : > { %v527_v63 = vmax.f32 %v514_v59, %v525_v60 }
 0x25c   : > { %533 = vrot.lane.b32.xlu0 %v527_v63, %s1006_s17  ;;  %v531_v0 = vcombine.high %v527_v63, %v527_v63  ;;  %770 = vst [vmem:[%s1233_s24 + $0x10] sm:$0xff] %v527_v63 }
 0x25e   : > { %535 = vrot.lane.b32.xlu1 %v531_v0, %s1006_s17 }
 0x260   : > { %546 = vrot.lane.b32.xlu0 %v527_v63, %s1005_s21 }
 0x262   : > { %548 = vrot.lane.b32.xlu1 %v531_v0, %s1005_s21  ;;  %s921_s21 = sshll.u32 %s1013_s12, 4  ;;  %s922_s21 = int_to_ptr.vmem [resolvable:$false] %s921_s21 }
 0x263   : > { %s923_s17 = scalar_lea.vmem %s922_s21, 1024  ;;  %p924_p11 = scmp.lt.s32.totalorder %s1424_s27, %s922_s21 }
 0x264   : > { %559 = vrot.lane.b32.xlu0 %v527_v63, %s1007_s8  ;;  %p925_p2 = scmp.lt.s32.totalorder %s923_s17, %s917_s7 }
 0x266   : > { %561 = vrot.lane.b32.xlu1 %v531_v0, %s1007_s8  ;;  %p926_p12 = por %p925_p2, %p924_p11 }
 0x268   : > { %572 = vrot.lane.b32.xlu0 %v527_v63, %s1008_s19  ;;  %p927_p3 = pnand %p926_p12, %p920_p13 }
 0x26a   : > { %574 = vrot.lane.b32.xlu1 %v531_v0, %s1008_s19 }
 0x2ce   : > { %v534_v1 = vpop.permute.xlu0 %533 }
 0x2d0   : > { %v536_v2 = vpop.permute.xlu1 %535 }
 0x2d1   : > { %v537_v3 = vsel %vm305_vm1, %v534_v1, %v536_v2  ;;  %v538_v7 = vsel %vm305_vm1, %v536_v2, %v534_v1 }
 0x2d2   : > { %v547_v9 = vpop.permute.xlu0 %546  ;;  %v539_v10 = vadd.f32 %v537_v3, %v1183_v14  ;;  %v540_v11 = vadd.f32 %v538_v7, %v1186_v15 }
 0x2d4   : > { %v549_v17 = vpop.permute.xlu1 %548  ;;  %v543_v27 = vcombine.low %v539_v10, %v540_v11 }
 0x2d5   : > { %v550_v20 = vsel %vm319_vm0, %v547_v9, %v549_v17  ;;  %v551_v21 = vsel %vm319_vm0, %v549_v17, %v547_v9 }
 0x2d6   : > { %v552_v22 = vadd.f32 %v550_v20, %v1177_v12  ;;  %v553_v23 = vadd.f32 %v551_v21, %v1180_v13  ;;  %v560_v26 = vpop.permute.xlu0 %559  ;;  %v545_v32 = vmax.f32 %v527_v63, %v543_v27 }
 0x2d8   : > { %v562_v28 = vpop.permute.xlu1 %561  ;;  %v556_v15 = vcombine.low %v552_v22, %v553_v23 }
 0x2d9   : > { %v563_v29 = vsel %vm333_vm2, %v560_v26, %v562_v28  ;;  %v564_v14 = vsel %vm333_vm2, %v562_v28, %v560_v26 }
 0x2da   : > { %v565_v30 = vadd.f32 %v564_v14, %v1189_v18  ;;  %v566_v31 = vadd.f32 %v563_v29, %v1192_v19  ;;  %v573_v5 = vpop.permute.xlu0 %572  ;;  %v558_v36 = vmax.f32 %v545_v32, %v556_v15 }
 0x2dc   : > { %v569_v33 = vcombine.low %v565_v30, %v566_v31  ;;  %v575_v12 = vpop.permute.xlu1 %574 }
 0x2dd   : > { %v576_v13 = vsel %vm347_vm3, %v573_v5, %v575_v12  ;;  %v577_v6 = vsel %vm347_vm3, %v575_v12, %v573_v5 }
 0x2de   : > { %v578_v37 = vadd.f32 %v577_v6, %v1213_v34  ;;  %v579_v38 = vadd.f32 %v576_v13, %v1216_v35  ;;  %v571_v39 = vmax.f32 %v558_v36, %v569_v33 }
 0x2e0   : > { %v582_v40 = vcombine.low %v578_v37, %v579_v38 }
 0x2e2   : > { %v584_v18 = vmax.f32 %v571_v39, %v582_v40 }
 0x2e4   : > { %588 = vrot.lane.b32.xlu0 %v584_v18, %s1009_s15  ;;  %v586_v19 = vcombine.high %v584_v18, %v584_v18 }
 0x2e6   : > { %590 = vrot.lane.b32.xlu1 %v586_v19, %s1009_s15 }
 0x2e8   : > { %601 = vrot.lane.b32.xlu0 %v584_v18, %s1010_s16 }
 0x2ea   : > { %603 = vrot.lane.b32.xlu1 %v586_v19, %s1010_s16 }
 0x2ec   : > { %614 = vrot.lane.b32.xlu0 %v584_v18, %s1011_s23 }
 0x2ee   : > { %616 = vrot.lane.b32.xlu1 %v586_v19, %s1011_s23 }
 0x2f0   : > { %627 = vrot.lane.b32.xlu0 %v584_v18, %s1012_s18 }
 0x2f2   : > { %629 = vrot.lane.b32.xlu1 %v586_v19, %s1012_s18 }
 0x356   : > { %v589_v34 = vpop.permute.xlu0 %588 }
 0x358   : > { %v591_v35 = vpop.permute.xlu1 %590 }
 0x359   : > { %v592_v41 = vsel %vm364_vm4, %v589_v34, %v591_v35  ;;  %v593_v42 = vsel %vm364_vm4, %v591_v35, %v589_v34 }
 0x35a   : > { %v602_v43 = vpop.permute.xlu0 %601  ;;  %v594_v44 = vadd.f32 %v592_v41, %v1242_v55  ;;  %v595_v45 = vadd.f32 %v593_v42, %v1245_v56 }
 0x35c   : > { %v604_v46 = vpop.permute.xlu1 %603  ;;  %v598_v52 = vcombine.low %v594_v44, %v595_v45 }
 0x35d   : > { %v605_v47 = vsel %vm378_vm5, %v602_v43, %v604_v46  ;;  %v606_v48 = vsel %vm378_vm5, %v604_v46, %v602_v43 }
 0x35e   : > { %v607_v49 = vadd.f32 %v605_v47, %v1252_v61  ;;  %v608_v50 = vadd.f32 %v606_v48, %v1255_v62  ;;  %v615_v51 = vpop.permute.xlu0 %614  ;;  %v600_v59 = vmax.f32 %v584_v18, %v598_v52 }
 0x360   : > { %v617_v53 = vpop.permute.xlu1 %616  ;;  %v611_v54 = vcombine.low %v607_v49, %v608_v50 }
 0x361   : > { %v618_v55 = vsel %vm392_vm6, %v615_v51, %v617_v53  ;;  %v619_v56 = vsel %vm392_vm6, %v617_v53, %v615_v51 }
 0x362   : > { %v620_v57 = vadd.f32 %v619_v56, %v1265_v8  ;;  %v621_v58 = vadd.f32 %v618_v55, %v1270_v16  ;;  %v628_v62 = vpop.permute.xlu0 %627  ;;  %v613_v1 = vmax.f32 %v600_v59, %v611_v54 }
 0x364   : > { %v624_v61 = vcombine.low %v620_v57, %v621_v58  ;;  %v630_v60 = vpop.permute.xlu1 %629 }
 0x365   : > { %v631_v63 = vsel %vm406_vm7, %v628_v62, %v630_v60  ;;  %v632_v0 = vsel %vm406_vm7, %v630_v60, %v628_v62 }
 0x366   : > { %v633_v2 = vadd.f32 %v632_v0, %v1278_v24  ;;  %v634_v8 = vadd.f32 %v631_v63, %v1281_v25  ;;  %v626_v16 = vmax.f32 %v613_v1, %v624_v61 }
 0x368   : > { %v637_v3 = vcombine.low %v633_v2, %v634_v8 }
 0x36a   : > { %v639_v4 = vmax.f32 %v626_v16, %v637_v3 }
 0x36c   : > { %771 = vst [vmem:[%s1233_s24 + $0x18] sm:$0xff] %v639_v4 }
 0x36d   : > { %930 = shalt.err (!%p927_p3)
}
 0x36e   : > { %s931_s8 = scalar_lea.hbm %s1429_s4, 512  ;;  %s935_s16 = scalar_lea.hbm %s1480_s2, 1024 }
 0x36f   : > { %p932_p5 = scmp.ne.s32.totalorder %s1429_s4, %s931_s8  ;;  %p936_p4 = scmp.lt.s32.totalorder %s1429_s4, %s1480_s2 }
 0x370   : > { %p937_p10 = scmp.lt.s32.totalorder %s935_s16, %s931_s8 }
 0x371   : > { %p933_p7 = pnand %p932_p5, %p1117_p0 }
 0x372   : > { %p938_p9 = por %p937_p10, %p936_p4 }
 0x373   : > { %p934_p6 = pneg %p933_p7 }
 0x375   : > { %p939_p1 = pnand %p938_p9, %p934_p6 }
 0x377   : > { %942 = shalt.err (!%p939_p1)
}
 0x378   : > { %s1014_s24 = smov 128   ;;  %s1015_s18 = smov 8  }
 0x379   : > { %785 = dma.vmem_to_hbm [thread:$0]  (%p1117_p0), %s1424_s27, 512, %s1429_s4, %s643_s6, %s1014_s24, %s1014_s24, %s1015_s18  }
 0x37a PF: > { %s673_s26 = sand.u32 1, %s981_s9   ;;  %p1491_p8 = scmp.ne.s32.totalorder %s1485_s20, 0 }
 0x37b   : > { %p1492_p13 = scmp.ge.s32.totalorder %s1001_s14, 2  ;;  %s674_s28 = scalar_lea.sflag [#allocation4], %s673_s26 }
 0x37d   : > { %p796_p11 = pnand %p1492_p13, %p1491_p8 }
 0x37f   : > { %p797_p2 = pneg %p796_p11 }
 0x381   : > { %976 = dma.done.wait (%p797_p2), %s674_s28, 512  }
 0x382   : > { %978 = vsyncadd (%p797_p2), %s674_s28, 4294966784  ;;  %s19_s14 = sadd.s32 1, %s1001_s14   ;;  %s1493_s9 = smov %s985_s10 }
 0x383   : > { %p16_p12 = scmp.ge.s32.totalorder %s19_s14, 4   ;;  %s1494_s10 = smov %s989_s11 }
 0x384   : > { %s1495_s11 = smov %s1123_s5  ;;  %s1496_s12 = smov %s997_s13 }
 0x385   : > { %s1497_s13 = smov %s1499_s25  ;;  %18 = sbr.rel (!%p16_p12) target bundleno = 7 (0x7), region = 88 }
 0x38a   :  { %679 = vsyncpa [#allocation3], 1 }
 0x38b   :  { %681 = vsyncpa [#allocation3 + $0x1], 1 }
 0x38c   :  { %682 = vsyncpa [#allocation6], 1 }
 0x38d   :  { %684 = vsyncpa [#allocation6 + $0x1], 1 }
 0x38e   :  { %685 = vsyncpa [#allocation4], 1 }
 0x38f   :  { %687 = vsyncpa [#allocation4 + $0x1], 1 }

</bundles_post_ra>
